<compile_context>
chip_gen: v6e
topology: v6e:2x2x1
jax: 0.10.0
libtpu: 0.0.40
codegen_flags: <defaults>
</compile_context>

<pallas_src>
import functools
import math

import jax
import jax.numpy as jnp
from jax.experimental import pallas as pl
from jax.experimental.pallas import tpu as pltpu

HIDDEN_SIZE = 256
HEAD_LANES = 128          # padded (actor logits | critic value | zeros) output lanes
DEFAULT_BLOCK_ROWS = 512  # raise to 1024 on v6e for very large batches
ROW_ALIGN = 16            # bf16 output sublane packing (also a multiple of 8 for f32)


def _round_up(x, m):
    return (x + m - 1) // m * m


# ----------------------------------------------------------------------------
# Kernel: one batch tile per grid step. Two trunk matmuls + ReLU, one fused
# head matmul, masked softmax over the actor lanes, lane-dense bf16 store.
# ----------------------------------------------------------------------------
def actor_critic_kernel(x_ref, w1_ref, b1_ref, w2_ref, b2_ref,
                        wh_ref, bh_ref, masks_ref, out_ref):
    # shared trunk (bf16 MXU operands, f32 accumulation, f32 elementwise)
    x = x_ref[...].astype(jnp.bfloat16)          # in-register cast (hidden under MXU)
    h1 = jnp.dot(x, w1_ref[...],
                 preferred_element_type=jnp.float32) + b1_ref[...]
    h1 = jnp.maximum(h1, 0.0)
    h2 = jnp.dot(h1.astype(jnp.bfloat16), w2_ref[...],
                 preferred_element_type=jnp.float32) + b2_ref[...]
    h2 = jnp.maximum(h2, 0.0)

    # fused actor+critic head: one (256, 128) matmul
    head = jnp.dot(h2.astype(jnp.bfloat16), wh_ref[...],
                   preferred_element_type=jnp.float32) + bh_ref[...]

    masks = masks_ref[...]
    smask = masks[0:1, :]   # 0 on actor lanes, -1e30 elsewhere (incl. critic lane)
    vmask = masks[1:2, :]   # f32 one-hot at the critic lane

    # max-stabilized softmax over actor lanes (masked lanes underflow to exactly 0)
    logits = head + smask
    m = jnp.max(logits, axis=-1, keepdims=True)
    e = jnp.exp(logits - m)
    denom = jnp.sum(e, axis=-1, keepdims=True)
    probs = e * pl.reciprocal(denom, approx=False)   # exact: probs sum to ~1

    # lane-dense store: [probs | value | zeros] in one unmasked 128-lane bf16 write
    out_ref[...] = (probs + head * vmask).astype(out_ref.dtype)


# ----------------------------------------------------------------------------
# Wrapper
# ----------------------------------------------------------------------------
def actor_critic_forward(x, kparams, *, block_rows=DEFAULT_BLOCK_ROWS):
    """x: [B, input_size] (any float dtype). Returns (probs [B, A], value [B, 1])."""
    if x.ndim == 1:
        x = x[None, :]
    num_actions = kparams["num_actions"]
    input_size = kparams["w1"].shape[0]
    assert x.shape[1] == input_size, (
        f"Input shape {x.shape[1]} doesn't match expected shape {input_size}")
    B = x.shape[0]

    # Pad only to the row alignment (not to a full tile), then pick a row tile
    # that (a) is a multiple of ROW_ALIGN, (b) gives >= 2 grid steps whenever
    # possible so the "parallel" batch axis shards across v7x's 2 TensorCores,
    # and (c) bounds total padding waste by < one tile.
    block_rows = max(ROW_ALIGN, _round_up(block_rows, ROW_ALIGN))
    pb = _round_up(max(B, 1), ROW_ALIGN)
    n_steps = max(pl.cdiv(pb, block_rows), 2)
    tm = min(block_rows, _round_up(pl.cdiv(pb, n_steps), ROW_ALIGN))
    padded_b = _round_up(pb, tm)
    if padded_b != B:
        x = jnp.pad(x, ((0, padded_b - B), (0, 0)))

    grid = (padded_b // tm,)

    flops = 2 * padded_b * (input_size * HIDDEN_SIZE
                            + HIDDEN_SIZE * HIDDEN_SIZE
                            + HIDDEN_SIZE * HEAD_LANES)
    bytes_accessed = (
        padded_b * input_size * x.dtype.itemsize        # x in native dtype
        + (input_size * HIDDEN_SIZE
           + HIDDEN_SIZE * HIDDEN_SIZE
           + HIDDEN_SIZE * HEAD_LANES) * 2              # weights (bf16)
        + (2 * HIDDEN_SIZE + HEAD_LANES) * 4            # biases (f32)
        + 2 * HEAD_LANES * 4                            # masks (f32)
        + padded_b * HEAD_LANES * 2                     # output slab (bf16)
    )

    out = pl.pallas_call(
        actor_critic_kernel,
        out_shape=jax.ShapeDtypeStruct((padded_b, HEAD_LANES), jnp.bfloat16),
        grid=grid,
        in_specs=[
            pl.BlockSpec((tm, input_size), lambda i: (i, 0)),           # x tile
            pl.BlockSpec((input_size, HIDDEN_SIZE), lambda i: (0, 0)),  # w1 (resident)
            pl.BlockSpec((1, HIDDEN_SIZE), lambda i: (0, 0)),           # b1
            pl.BlockSpec((HIDDEN_SIZE, HIDDEN_SIZE), lambda i: (0, 0)), # w2
            pl.BlockSpec((1, HIDDEN_SIZE), lambda i: (0, 0)),           # b2
            pl.BlockSpec((HIDDEN_SIZE, HEAD_LANES), lambda i: (0, 0)),  # fused head W
            pl.BlockSpec((1, HEAD_LANES), lambda i: (0, 0)),            # fused head b
            pl.BlockSpec((2, HEAD_LANES), lambda i: (0, 0)),            # softmax/value masks
        ],
        out_specs=pl.BlockSpec((tm, HEAD_LANES), lambda i: (i, 0)),
        compiler_params=pltpu.CompilerParams(
            dimension_semantics=("parallel",),
        ),
        cost_estimate=pl.CostEstimate(
            flops=flops,
            transcendentals=padded_b * HEAD_LANES,
            bytes_accessed=bytes_accessed,
        ),
    )(
        x,
        kparams["w1"], kparams["b1"],
        kparams["w2"], kparams["b2"],
        kparams["wh"], kparams["bh"],
        kparams["masks"],
    )

    probs = out[:B, :num_actions].astype(jnp.float32)
    value = out[:B, num_actions:num_actions + 1].astype(jnp.float32)
    return probs, value


# ----------------------------------------------------------------------------
# Parameter init mirroring the PyTorch module (orthogonal weights, zero biases),
# plus packing into the fused/bf16 kernel layout.
# ----------------------------------------------------------------------------
def _orthogonal(key, out_dim, in_dim, gain):
    a = jax.random.normal(key, (max(out_dim, in_dim), min(out_dim, in_dim)),
                          jnp.float32)
    q, r = jnp.linalg.qr(a)
    q = q * jnp.sign(jnp.diagonal(r))
    if out_dim < in_dim:
        q = q.T
    return gain * q[:out_dim, :in_dim]


def init_params(key, input_size, num_actions):
    k1, k2, k3, k4 = jax.random.split(key, 4)
    relu_gain = math.sqrt(2.0)
    # PyTorch Linear stores (out, in); pre-transpose to (in, out) for y = x @ W.
    return {
        "w1": _orthogonal(k1, HIDDEN_SIZE, input_size, relu_gain).T,
        "b1": jnp.zeros((1, HIDDEN_SIZE), jnp.float32),
        "w2": _orthogonal(k2, HIDDEN_SIZE, HIDDEN_SIZE, relu_gain).T,
        "b2": jnp.zeros((1, HIDDEN_SIZE), jnp.float32),
        "wa": _orthogonal(k3, num_actions, HIDDEN_SIZE, 0.01).T,
        "ba": jnp.zeros((1, num_actions), jnp.float32),
        "wc": _orthogonal(k4, 1, HIDDEN_SIZE, 1.0).T,
        "bc": jnp.zeros((1, 1), jnp.float32),
    }


def prepare_kernel_params(p, num_actions):
    """Fuse actor|critic heads into one lane-padded weight, cast to bf16, and
    precompute the (2, 128) softmax/value mask slab."""
    assert num_actions + 1 <= HEAD_LANES, (
        f"num_actions={num_actions} does not fit in the {HEAD_LANES}-lane head")
    wh = jnp.zeros((HIDDEN_SIZE, HEAD_LANES), jnp.float32)
    wh = wh.at[:, :num_actions].set(p["wa"])
    wh = wh.at[:, num_actions:num_actions + 1].set(p["wc"])
    bh = jnp.zeros((1, HEAD_LANES), jnp.float32)
    bh = bh.at[:, :num_actions].set(p["ba"])
    bh = bh.at[:, num_actions:num_actions + 1].set(p["bc"])

    lane = jnp.arange(HEAD_LANES)
    smask = jnp.where(lane < num_actions, 0.0, -1e30).astype(jnp.float32)
    vmask = (lane == num_actions).astype(jnp.float32)
    masks = jnp.stack([smask, vmask], axis=0)      # (2, HEAD_LANES), resident

    return {
        "w1": p["w1"].astype(jnp.bfloat16),
        "b1": p["b1"],
        "w2": p["w2"].astype(jnp.bfloat16),
        "b2": p["b2"],
        "wh": wh.astype(jnp.bfloat16),
        "bh": bh,
        "masks": masks,
        "num_actions": num_actions,
    }


def reference_forward(x, p):
    """Pure-JAX f32 reference matching the PyTorch forward."""
    h1 = jnp.maximum(x @ p["w1"] + p["b1"], 0.0)
    h2 = jnp.maximum(h1 @ p["w2"] + p["b2"], 0.0)
    logits = h2 @ p["wa"] + p["ba"]
    probs = jax.nn.softmax(logits, axis=-1)
    value = h2 @ p["wc"] + p["bc"]
    return probs, value


if __name__ == "__main__":
    INPUT_SIZE = 32
    NUM_ACTIONS = 8
    BATCH = 4

    key = jax.random.PRNGKey(0)
    pkey, xkey = jax.random.split(key)
    params = init_params(pkey, INPUT_SIZE, NUM_ACTIONS)
    kparams = prepare_kernel_params(params, NUM_ACTIONS)
    x = jax.random.normal(xkey, (BATCH, INPUT_SIZE), jnp.float32)

    action_probs, value = actor_critic_forward(x, kparams)
    jax.block_until_ready((action_probs, value))

    # sanity: shapes, softmax normalization, agreement with f32 reference
    # (bf16 matmul operands + bf16 output store -> ~1e-2 tolerance).
    assert action_probs.shape == (BATCH, NUM_ACTIONS)
    assert value.shape == (BATCH, 1)
    assert bool(jnp.allclose(jnp.sum(action_probs, axis=-1), 1.0, atol=1e-2))

    ref_probs, ref_value = reference_forward(x, params)
    assert bool(jnp.allclose(action_probs, ref_probs, atol=2e-2))
    assert bool(jnp.allclose(value, ref_value, atol=5e-2))

    print("KERNEL_OK")
</pallas_src>

<mosaic_0001>
module attributes {stable_mosaic.version = 11 : i64} {
  func.func @actor_critic_kernel(%arg0: i32, %arg1: memref<16x32xf32, #tpu.memory_space<vmem>>, %arg2: memref<32x256xbf16, #tpu.memory_space<vmem>>, %arg3: memref<1x256xf32, #tpu.memory_space<vmem>>, %arg4: memref<256x256xbf16, #tpu.memory_space<vmem>>, %arg5: memref<1x256xf32, #tpu.memory_space<vmem>>, %arg6: memref<256x128xbf16, #tpu.memory_space<vmem>>, %arg7: memref<1x128xf32, #tpu.memory_space<vmem>>, %arg8: memref<2x128xf32, #tpu.memory_space<vmem>>, %arg9: memref<16x128xbf16, #tpu.memory_space<vmem>>) attributes {dimension_semantics = [#tpu.dimension_semantics<parallel>], iteration_bounds = array<i64: 1>, scalar_prefetch = 0 : i64, scratch_operands = 0 : i64, tpu.core_type = #tpu.core_type<tc>, window_params = [{transform_indices = @transform_0, window_bounds = array<i64: 16, 32>}, {pipeline_mode = #tpu.pipeline_mode<synchronous>, transform_indices = @transform_1, window_bounds = array<i64: 32, 256>}, {pipeline_mode = #tpu.pipeline_mode<synchronous>, transform_indices = @transform_2, window_bounds = array<i64: 1, 256>}, {pipeline_mode = #tpu.pipeline_mode<synchronous>, transform_indices = @transform_3, window_bounds = array<i64: 256, 256>}, {pipeline_mode = #tpu.pipeline_mode<synchronous>, transform_indices = @transform_4, window_bounds = array<i64: 1, 256>}, {pipeline_mode = #tpu.pipeline_mode<synchronous>, transform_indices = @transform_5, window_bounds = array<i64: 256, 128>}, {pipeline_mode = #tpu.pipeline_mode<synchronous>, transform_indices = @transform_6, window_bounds = array<i64: 1, 128>}, {pipeline_mode = #tpu.pipeline_mode<synchronous>, transform_indices = @transform_7, window_bounds = array<i64: 2, 128>}, {transform_indices = @transform_8, window_bounds = array<i64: 16, 128>}]} {
    %c0 = arith.constant 0 : index
    %c0_0 = arith.constant 0 : index
    %0 = vector.load %arg1[%c0, %c0_0] : memref<16x32xf32, #tpu.memory_space<vmem>>, vector<16x32xf32>
    %1 = arith.truncf %0 : vector<16x32xf32> to vector<16x32xbf16>
    %c0_1 = arith.constant 0 : index
    %c0_2 = arith.constant 0 : index
    %2 = vector.load %arg2[%c0_1, %c0_2] : memref<32x256xbf16, #tpu.memory_space<vmem>>, vector<32x256xbf16>
    %cst = arith.constant dense<0.000000e+00> : vector<16x256xf32>
    %3 = tpu.matmul %1, %2, %cst {dimension_numbers = #tpu.dot_dimension_numbers<[1], [0], [0], [1], [0, 0, 1, 1], [], []>} : vector<16x32xbf16>, vector<32x256xbf16>, vector<16x256xf32> -> vector<16x256xf32>
    %c0_3 = arith.constant 0 : index
    %c0_4 = arith.constant 0 : index
    %4 = vector.load %arg3[%c0_3, %c0_4] : memref<1x256xf32, #tpu.memory_space<vmem>>, vector<1x256xf32>
    %5 = vector.broadcast %4 : vector<1x256xf32> to vector<16x256xf32>
    %6 = arith.addf %3, %5 : vector<16x256xf32>
    %cst_5 = arith.constant 0.000000e+00 : f32
    %7 = vector.broadcast %cst_5 : f32 to vector<16x256xf32>
    %8 = arith.maximumf %6, %7 : vector<16x256xf32>
    %9 = arith.truncf %8 : vector<16x256xf32> to vector<16x256xbf16>
    %c0_6 = arith.constant 0 : index
    %c0_7 = arith.constant 0 : index
    %10 = vector.load %arg4[%c0_6, %c0_7] : memref<256x256xbf16, #tpu.memory_space<vmem>>, vector<256x256xbf16>
    %cst_8 = arith.constant dense<0.000000e+00> : vector<16x256xf32>
    %11 = tpu.matmul %9, %10, %cst_8 {dimension_numbers = #tpu.dot_dimension_numbers<[1], [0], [0], [1], [0, 0, 1, 1], [], []>} : vector<16x256xbf16>, vector<256x256xbf16>, vector<16x256xf32> -> vector<16x256xf32>
    %c0_9 = arith.constant 0 : index
    %c0_10 = arith.constant 0 : index
    %12 = vector.load %arg5[%c0_9, %c0_10] : memref<1x256xf32, #tpu.memory_space<vmem>>, vector<1x256xf32>
    %13 = vector.broadcast %12 : vector<1x256xf32> to vector<16x256xf32>
    %14 = arith.addf %11, %13 : vector<16x256xf32>
    %cst_11 = arith.constant 0.000000e+00 : f32
    %15 = vector.broadcast %cst_11 : f32 to vector<16x256xf32>
    %16 = arith.maximumf %14, %15 : vector<16x256xf32>
    %17 = arith.truncf %16 : vector<16x256xf32> to vector<16x256xbf16>
    %c0_12 = arith.constant 0 : index
    %c0_13 = arith.constant 0 : index
    %18 = vector.load %arg6[%c0_12, %c0_13] : memref<256x128xbf16, #tpu.memory_space<vmem>>, vector<256x128xbf16>
    %cst_14 = arith.constant dense<0.000000e+00> : vector<16x128xf32>
    %19 = tpu.matmul %17, %18, %cst_14 {dimension_numbers = #tpu.dot_dimension_numbers<[1], [0], [0], [1], [0, 0, 1, 1], [], []>} : vector<16x256xbf16>, vector<256x128xbf16>, vector<16x128xf32> -> vector<16x128xf32>
    %c0_15 = arith.constant 0 : index
    %c0_16 = arith.constant 0 : index
    %20 = vector.load %arg7[%c0_15, %c0_16] : memref<1x128xf32, #tpu.memory_space<vmem>>, vector<1x128xf32>
    %21 = vector.broadcast %20 : vector<1x128xf32> to vector<16x128xf32>
    %22 = arith.addf %19, %21 : vector<16x128xf32>
    %c0_17 = arith.constant 0 : index
    %c0_18 = arith.constant 0 : index
    %23 = vector.load %arg8[%c0_17, %c0_18] : memref<2x128xf32, #tpu.memory_space<vmem>>, vector<2x128xf32>
    %24 = vector.extract_strided_slice %23 {offsets = [0, 0], sizes = [1, 128], strides = [1, 1]} : vector<2x128xf32> to vector<1x128xf32>
    %25 = vector.extract_strided_slice %23 {offsets = [1, 0], sizes = [1, 128], strides = [1, 1]} : vector<2x128xf32> to vector<1x128xf32>
    %26 = vector.broadcast %24 : vector<1x128xf32> to vector<16x128xf32>
    %27 = arith.addf %22, %26 : vector<16x128xf32>
    %cst_19 = arith.constant dense<0xFF800000> : vector<16xf32>
    %28 = vector.multi_reduction <maximumf>, %27, %cst_19 [1] : vector<16x128xf32> to vector<16xf32>
    %29 = vector.shape_cast %28 : vector<16xf32> to vector<16x1xf32>
    %30 = vector.broadcast %29 : vector<16x1xf32> to vector<16x128xf32>
    %31 = arith.subf %27, %30 : vector<16x128xf32>
    %32 = math.exp %31 : vector<16x128xf32>
    %cst_20 = arith.constant dense<0.000000e+00> : vector<16xf32>
    %33 = vector.multi_reduction <add>, %32, %cst_20 [1] : vector<16x128xf32> to vector<16xf32>
    %34 = vector.shape_cast %33 : vector<16xf32> to vector<16x1xf32>
    %35 = tpu.reciprocal %34 : vector<16x1xf32> -> vector<16x1xf32>
    %36 = vector.broadcast %35 : vector<16x1xf32> to vector<16x128xf32>
    %37 = arith.mulf %32, %36 : vector<16x128xf32>
    %38 = vector.broadcast %25 : vector<1x128xf32> to vector<16x128xf32>
    %39 = arith.mulf %22, %38 : vector<16x128xf32>
    %40 = arith.addf %37, %39 : vector<16x128xf32>
    %41 = arith.truncf %40 : vector<16x128xf32> to vector<16x128xbf16>
    %c0_21 = arith.constant 0 : index
    %c0_22 = arith.constant 0 : index
    %42 = vector.load %arg9[%c0_21, %c0_22] : memref<16x128xbf16, #tpu.memory_space<vmem>>, vector<16x128xbf16>
    tpu.vector_store %arg9[%c0_21, %c0_22], %41 {strides = array<i32>} : memref<16x128xbf16, #tpu.memory_space<vmem>>, vector<16x128xbf16>,
    return
  }
  func.func @transform_0(%arg0: i32) -> (i32, i32) {
    %c0_i32 = arith.constant 0 : i32
    %c0_i32_0 = arith.constant 0 : i32
    return %arg0, %c0_i32 : i32, i32
  }
  func.func @transform_1(%arg0: i32) -> (i32, i32) {
    %c0_i32 = arith.constant 0 : i32
    %c0_i32_0 = arith.constant 0 : i32
    %c0_i32_1 = arith.constant 0 : i32
    return %c0_i32, %c0_i32_0 : i32, i32
  }
  func.func @transform_2(%arg0: i32) -> (i32, i32) {
    %c0_i32 = arith.constant 0 : i32
    %c0_i32_0 = arith.constant 0 : i32
    %c0_i32_1 = arith.constant 0 : i32
    return %c0_i32, %c0_i32_0 : i32, i32
  }
  func.func @transform_3(%arg0: i32) -> (i32, i32) {
    %c0_i32 = arith.constant 0 : i32
    %c0_i32_0 = arith.constant 0 : i32
    %c0_i32_1 = arith.constant 0 : i32
    return %c0_i32, %c0_i32_0 : i32, i32
  }
  func.func @transform_4(%arg0: i32) -> (i32, i32) {
    %c0_i32 = arith.constant 0 : i32
    %c0_i32_0 = arith.constant 0 : i32
    %c0_i32_1 = arith.constant 0 : i32
    return %c0_i32, %c0_i32_0 : i32, i32
  }
  func.func @transform_5(%arg0: i32) -> (i32, i32) {
    %c0_i32 = arith.constant 0 : i32
    %c0_i32_0 = arith.constant 0 : i32
    %c0_i32_1 = arith.constant 0 : i32
    return %c0_i32, %c0_i32_0 : i32, i32
  }
  func.func @transform_6(%arg0: i32) -> (i32, i32) {
    %c0_i32 = arith.constant 0 : i32
    %c0_i32_0 = arith.constant 0 : i32
    %c0_i32_1 = arith.constant 0 : i32
    return %c0_i32, %c0_i32_0 : i32, i32
  }
  func.func @transform_7(%arg0: i32) -> (i32, i32) {
    %c0_i32 = arith.constant 0 : i32
    %c0_i32_0 = arith.constant 0 : i32
    %c0_i32_1 = arith.constant 0 : i32
    return %c0_i32, %c0_i32_0 : i32, i32
  }
  func.func @transform_8(%arg0: i32) -> (i32, i32) {
    %c0_i32 = arith.constant 0 : i32
    %c0_i32_0 = arith.constant 0 : i32
    return %arg0, %c0_i32 : i32, i32
  }
}

</mosaic_0001>

<bundles_post_ra>
// kernel: tpu_custom_call.1
= control target key start
LH: loop header
LB: loop body
LE: loop exit
PB: predicated region body
PF: predicated region fallthrough
CT: control target
= control target key end

     0   :  { %13 = vsyncpa [#allocation3], 0  ;;  %s1038_s0 = inlined_call_operand.hbm [shape: f32[16,32], index: 0, kind: input, shape index: {}]   ;;  %s1039_s1 = inlined_call_operand.hbm [shape: bf16[32,256], index: 1, kind: input, shape index: {}]   ;;  %s1040_s2 = inlined_call_operand.vmem [shape: f32[1,256], index: 2, kind: input, shape index: {}]   ;;  %s1041_s3 = inlined_call_operand.hbm [shape: bf16[256,256], index: 3, kind: input, shape index: {}]   ;;  %s1042_s4 = inlined_call_operand.vmem [shape: f32[1,256], index: 4, kind: input, shape index: {}]   ;;  %s1043_s5 = inlined_call_operand.hbm [shape: bf16[256,128], index: 5, kind: input, shape index: {}]   ;;  %s1044_s6 = inlined_call_operand.vmem [shape: f32[1,128], index: 6, kind: input, shape index: {}]   ;;  %s1045_s7 = inlined_call_operand.vmem [shape: f32[2,128], index: 7, kind: input, shape index: {}]   ;;  %s1046_s8 = inlined_call_operand.hbm [shape: bf16[16,128], index: 8, kind: output, shape index: {}]  }
   0x1   :  { %14 = vsyncpa [#allocation6], 0 }
   0x2   :  { %15 = vsyncpa [#allocation9], 0 }
   0x3   :  { %16 = vsyncpa [#allocation4], 0  ;;  %s950_s27 = smov [#allocation5]   ;;  %s951_s29 = smov [#allocation2]  }
   0x4   :  { %s34_s28 = sshll.u32 %s950_s27, 4  ;;  %s22_s30 = sshll.u32 %s951_s29, 4  ;;  %s35_s28 = int_to_ptr.vmem [resolvable:$true] %s34_s28  ;;  %s23_s30 = int_to_ptr.vmem [resolvable:$true] %s22_s30 }
   0x5   :  { %s850_s9 = scalar_lea.vmem %s35_s28, 512  ;;  %p855_p1 = scmp.lt.s32.totalorder %s35_s28, %s35_s28 }
   0x6   :  { %p851_p0 = scmp.ne.s32.totalorder %s35_s28, %s850_s9  ;;  %p856_p2 = scmp.lt.s32.totalorder %s850_s9, %s850_s9 }
   0x8   :  { %p857_p3 = por %p856_p2, %p855_p1 }
   0xa   :  { %p858_p4 = pnand %p857_p3, %p851_p0 }
   0xc   :  { %861 = shalt.err (!%p858_p4)
}
   0xd   :  { %s952_s10 = smov 128   ;;  %s953_s11 = smov 8  }
   0xe   :  { %40 = dma.hbm_to_vmem [thread:$0]  %s1039_s1, 512, %s35_s28, [#allocation6], %s952_s10, %s952_s10, %s953_s11  }
   0xf   :  { %s870_s14 = scalar_lea.vmem %s23_s30, 256  ;;  %p875_p6 = scmp.lt.s32.totalorder %s23_s30, %s23_s30 }
  0x10   :  { %p871_p5 = scmp.ne.s32.totalorder %s23_s30, %s870_s14  ;;  %p876_p7 = scmp.lt.s32.totalorder %s870_s14, %s870_s14 }
  0x12   :  { %p877_p8 = por %p876_p7, %p875_p6 }
  0x14   :  { %p878_p9 = pnand %p877_p8, %p871_p5 }
  0x16   :  { %881 = shalt.err (!%p878_p9)
}
  0x17   :  { %28 = dma.hbm_to_vmem [thread:$0]  %s1038_s0, 256, %s23_s30, [#allocation3], %s952_s10, %s952_s10, %s953_s11  }
  0x18   :  { %s954_s17 = smov [#allocation7]   ;;  %s955_s19 = smov [#allocation8]  }
  0x19   :  { %s48_s18 = sshll.u32 %s954_s17, 4  ;;  %s62_s20 = sshll.u32 %s955_s19, 4  ;;  %s49_s18 = int_to_ptr.vmem [resolvable:$true] %s48_s18  ;;  %s63_s20 = int_to_ptr.vmem [resolvable:$true] %s62_s20 }
  0x1a   :  { %s890_s21 = scalar_lea.vmem %s49_s18, 4096  ;;  %p895_p11 = scmp.lt.s32.totalorder %s49_s18, %s49_s18 }
  0x1b   :  { %p891_p10 = scmp.ne.s32.totalorder %s49_s18, %s890_s21  ;;  %p896_p12 = scmp.lt.s32.totalorder %s890_s21, %s890_s21 }
  0x1d   :  { %p897_p13 = por %p896_p12, %p895_p11 }
  0x1f   :  { %p898_p0 = pnand %p897_p13, %p891_p10 }
  0x21   :  { %901 = shalt.err (!%p898_p0)
}
  0x22   :  { %54 = dma.hbm_to_vmem [thread:$0]  %s1041_s3, 4096, %s49_s18, [#allocation6], %s952_s10, %s952_s10, %s953_s11  }
  0x23   :  { %s910_s23 = scalar_lea.vmem %s63_s20, 2048  ;;  %p915_p2 = scmp.lt.s32.totalorder %s63_s20, %s63_s20 }
  0x24   :  { %p911_p1 = scmp.ne.s32.totalorder %s63_s20, %s910_s23  ;;  %p916_p3 = scmp.lt.s32.totalorder %s910_s23, %s910_s23 }
  0x26   :  { %p917_p4 = por %p916_p3, %p915_p2 }
  0x28   :  { %p918_p5 = pnand %p917_p4, %p911_p1 }
  0x2a   :  { %921 = shalt.err (!%p918_p5)
}
  0x2b   :  { %s956_s0 = smov 64   ;;  %s957_s24 = smov 4  }
  0x2c   :  { %68 = dma.hbm_to_vmem [thread:$0]  %s1043_s5, 2048, %s63_s20, [#allocation9], %s956_s0, %s956_s0, %s957_s24  }
  0x2d   :  { %942 = dma.done.wait [#allocation3], 256  }
  0x2e   :  { %943 = vsyncadd [#allocation3], 4294967040 }
  0x2f   :  { %944 = dma.done.wait [#allocation6], 4608  }
  0x30   :  { %945 = vsyncadd [#allocation6], 4294962688 }
  0x31   :  { %946 = dma.done.wait [#allocation9], 2048  }
  0x32   :  { %947 = vsyncadd [#allocation9], 4294965248  ;;  %v958_v0 = vmov 0   ;;  %v764_v1 = vld [vmem:[#allocation5 + $0x14] ss:$8 sps:$4 sm:$0xff]   ;;  %vm125_vm0 = vcmask 261120   ;;  %v95_v50 = vlaneseq }
  0x33   :  { %161 = vmatprep.mubr.bf16.mxu0 %v958_v0  ;;  %v766_v2 = vld [vmem:[#allocation5 + $0x10] ss:$8 sps:$4 sm:$0xff]   ;;  %141 = vmatprep.subr.bf16.mxu0 %v764_v1  ;;  %v767_v3 = vld [vmem:[#allocation5 + $0x4] ss:$8 sps:$4 sm:$0xff]   ;;  %v769_v4 = vld [vmem:[#allocation5] ss:$8 sps:$4 sm:$0xff]  }
  0x34   :  { %v86_v5 = vld [vmem:[#allocation2] sm:$0xff]  ;;  %142 = vmatpush1.bf16.msra.mxu0 %v766_v2  ;;  %v87_v6 = vld [vmem:[#allocation2 + $0x8] sm:$0xff]  ;;  %v773_v9 = vld [vmem:[#allocation7 + $0x64] ss:$8 sps:$4 sm:$0xff]   ;;  %v96_v51 = vshrl.u32 %v95_v50, 7 }
  0x35   :  { %143 = vmatprep.subr.bf16.mxu0 %v767_v3  ;;  %v770_v7 = vld [vmem:[#allocation7 + $0x74] ss:$8 sps:$4 sm:$0xff]   ;;  %v772_v8 = vld [vmem:[#allocation7 + $0x70] ss:$8 sps:$4 sm:$0xff]   ;;  %v88_v10 = vpack.c.bf16 %v87_v6, %v86_v5  ;;  %v775_v11 = vld [vmem:[#allocation7 + $0x60] ss:$8 sps:$4 sm:$0xff]  }
  0x36   :  { %382 = vmatprep.subr.bf16.mxu1 %v770_v7  ;;  %v776_v12 = vld [vmem:[#allocation7 + $0x54] ss:$8 sps:$4 sm:$0xff]   ;;  %v778_v13 = vld [vmem:[#allocation7 + $0x50] ss:$8 sps:$4 sm:$0xff]   ;;  %v779_v14 = vld [vmem:[#allocation7 + $0x44] ss:$8 sps:$4 sm:$0xff]  }
  0x37   :  { %383 = vmatpush1.bf16.msra.mxu1 %v772_v8  ;;  %v781_v15 = vld [vmem:[#allocation7 + $0x40] ss:$8 sps:$4 sm:$0xff]   ;;  %v782_v16 = vld [vmem:[#allocation7 + $0x34] ss:$8 sps:$4 sm:$0xff]   ;;  %v784_v17 = vld [vmem:[#allocation7 + $0x30] ss:$8 sps:$4 sm:$0xff]  }
  0x38   :  { %144 = vmatpush1.bf16.msra.mxu0 %v769_v4  ;;  %384 = vmatprep.subr.bf16.mxu1 %v773_v9  ;;  %v785_v18 = vld [vmem:[#allocation7 + $0x24] ss:$8 sps:$4 sm:$0xff]   ;;  %v787_v19 = vld [vmem:[#allocation7 + $0x20] ss:$8 sps:$4 sm:$0xff]   ;;  %v788_v20 = vld [vmem:[#allocation7 + $0x14] ss:$8 sps:$4 sm:$0xff]  }
  0x39   :  { %v790_v21 = vld [vmem:[#allocation7 + $0x10] ss:$8 sps:$4 sm:$0xff]   ;;  %v791_v22 = vld [vmem:[#allocation7 + $0x4] ss:$8 sps:$4 sm:$0xff]   ;;  %v793_v23 = vld [vmem:[#allocation7] ss:$8 sps:$4 sm:$0xff]  }
  0x3a   :  { %v794_v24 = vld [vmem:[#allocation7 + $0xf4] ss:$8 sps:$4 sm:$0xff]   ;;  %v796_v25 = vld [vmem:[#allocation7 + $0xf0] ss:$8 sps:$4 sm:$0xff]   ;;  %v797_v26 = vld [vmem:[#allocation7 + $0xe4] ss:$8 sps:$4 sm:$0xff]  }
  0x3b   :  { %673 = vmatmul.mubr.msk.bf16.vlgmr.msra.gmra.mxu0 %vm125_vm0, %v88_v10  ;;  %385 = vmatpush1.bf16.msra.mxu1 %v775_v11  ;;  %v799_v27 = vld [vmem:[#allocation7 + $0xe0] ss:$8 sps:$4 sm:$0xff]   ;;  %v800_v28 = vld [vmem:[#allocation7 + $0xd4] ss:$8 sps:$4 sm:$0xff]   ;;  %v802_v29 = vld [vmem:[#allocation7 + $0xd0] ss:$8 sps:$4 sm:$0xff]  }
  0x3c   :  { %386 = vmatprep.subr.bf16.mxu1 %v776_v12  ;;  %v803_v30 = vld [vmem:[#allocation7 + $0xc4] ss:$8 sps:$4 sm:$0xff]   ;;  %v805_v31 = vld [vmem:[#allocation7 + $0xc0] ss:$8 sps:$4 sm:$0xff]   ;;  %v806_v32 = vld [vmem:[#allocation7 + $0xb4] ss:$8 sps:$4 sm:$0xff]  }
  0x3d   :  { %v808_v33 = vld [vmem:[#allocation7 + $0xb0] ss:$8 sps:$4 sm:$0xff]   ;;  %v809_v34 = vld [vmem:[#allocation7 + $0xa4] ss:$8 sps:$4 sm:$0xff]   ;;  %v811_v35 = vld [vmem:[#allocation7 + $0xa0] ss:$8 sps:$4 sm:$0xff]  }
  0x3e   :  { %v812_v36 = vld [vmem:[#allocation7 + $0x94] ss:$8 sps:$4 sm:$0xff]   ;;  %v814_v37 = vld [vmem:[#allocation7 + $0x90] ss:$8 sps:$4 sm:$0xff]   ;;  %v815_v38 = vld [vmem:[#allocation7 + $0x84] ss:$8 sps:$4 sm:$0xff]  }
  0x3f   :  { %387 = vmatpush1.bf16.msra.mxu1 %v778_v13  ;;  %v817_v39 = vld [vmem:[#allocation7 + $0x80] ss:$8 sps:$4 sm:$0xff]   ;;  %v818_v40 = vld [vmem:[#allocation8 + $0x78] sm:$0xff]   ;;  %v820_v42 = vld [vmem:[#allocation8 + $0x70] sm:$0xff]   ;;  %v101_v52 = vsub.s32 1, %v96_v51  ;;  %v97_v53 = vsub.s32 0, %v96_v51 }
  0x40   :  { %388 = vmatprep.subr.bf16.mxu1 %v779_v14  ;;  %v819_v41 = vld [vmem:[#allocation8 + $0x38] sm:$0xff]   ;;  %732 = vmatprep.subr.bf16.mxu0 %v818_v40  ;;  %v821_v43 = vld [vmem:[#allocation8 + $0x30] sm:$0xff]   ;;  %v822_v44 = vld [vmem:[#allocation8 + $0x68] sm:$0xff]  }
  0x41   :  { %733 = vmatpush3.bf16.msra.mxu0 %v819_v41  ;;  %v823_v45 = vld [vmem:[#allocation8 + $0x28] sm:$0xff]   ;;  %v824_v46 = vld [vmem:[#allocation8 + $0x60] sm:$0xff]   ;;  %v826_v48 = vld [vmem:[#allocation8 + $0x58] sm:$0xff]  }
  0x42   :  { %734 = vmatprep.subr.bf16.mxu0 %v820_v42  ;;  %v825_v47 = vld [vmem:[#allocation8 + $0x20] sm:$0xff]   ;;  %v827_v49 = vld [vmem:[#allocation8 + $0x18] sm:$0xff]   ;;  %v93_v54 = vld [vmem:[%s1040_s2] sm:$0x3] }
  0x43   :  { %389 = vmatpush1.bf16.msra.mxu1 %v781_v15  ;;  %v102_v56 = vrot.slane %v93_v54, %v101_v52  ;;  %v98_v57 = vrot.slane %v93_v54, %v97_v53  ;;  %v828_v7 = vld [vmem:[#allocation8 + $0x50] sm:$0xff]   ;;  %v830_v9 = vld [vmem:[#allocation8 + $0x48] sm:$0xff]   ;;  %v832_v11 = vld [vmem:[#allocation8 + $0x40] sm:$0xff]  }
  0x44   :  { %390 = vmatprep.subr.bf16.mxu1 %v782_v16  ;;  %v829_v8 = vld [vmem:[#allocation8 + $0x10] sm:$0xff]   ;;  %v831_v10 = vld [vmem:[#allocation8 + $0x8] sm:$0xff]   ;;  %v833_v12 = vld [vmem:[#allocation8] sm:$0xff]  }
  0x45   :  { %735 = vmatpush3.bf16.msra.mxu0 %v821_v43  ;;  %v210_v13 = vld [vmem:[%s1042_s4] sm:$0x3] }
  0x46   :  { %736 = vmatprep.subr.bf16.mxu0 %v822_v44  ;;  %v219_v15 = vrot.slane %v210_v13, %v101_v52  ;;  %v215_v16 = vrot.slane %v210_v13, %v97_v53 }
  0x47   :  { %391 = vmatpush1.bf16.msra.mxu1 %v784_v17 }
  0x48   :  { %392 = vmatprep.subr.bf16.mxu1 %v785_v18 }
  0x49   :  { %737 = vmatpush3.bf16.msra.mxu0 %v823_v45 }
  0x4a   :  { %738 = vmatprep.subr.bf16.mxu0 %v824_v46 }
  0x4b   :  { %393 = vmatpush1.bf16.msra.mxu1 %v787_v19 }
  0x4c   :  { %394 = vmatprep.subr.bf16.mxu1 %v788_v20 }
  0x4d   :  { %739 = vmatpush3.bf16.msra.mxu0 %v825_v47 }
  0x4e   :  { %740 = vmatprep.subr.bf16.mxu0 %v826_v48 }
  0x4f   :  { %395 = vmatpush1.bf16.msra.mxu1 %v790_v21 }
  0x50   :  { %396 = vmatprep.subr.bf16.mxu1 %v791_v22 }
  0x51   :  { %741 = vmatpush3.bf16.msra.mxu0 %v827_v49 }
  0x52   :  { %742 = vmatprep.subr.bf16.mxu0 %v828_v7 }
  0x53   :  { %397 = vmatpush1.bf16.msra.mxu1 %v793_v23 }
  0x54   :  { %398 = vmatprep.subr.bf16.mxu1 %v794_v24 }
  0x55   :  { %743 = vmatpush3.bf16.msra.mxu0 %v829_v8 }
  0x56   :  { %744 = vmatprep.subr.bf16.mxu0 %v830_v9 }
  0x57   :  { %399 = vmatpush2.bf16.msra.mxu1 %v796_v25 }
  0x58   :  { %400 = vmatprep.subr.bf16.mxu1 %v797_v26 }
  0x59   :  { %745 = vmatpush3.bf16.msra.mxu0 %v831_v10 }
  0x5a   :  { %746 = vmatprep.subr.bf16.mxu0 %v832_v11 }
  0x5b   :  { %401 = vmatpush2.bf16.msra.mxu1 %v799_v27 }
  0x5c   :  { %402 = vmatprep.subr.bf16.mxu1 %v800_v28 }
  0x5d   :  { %747 = vmatpush3.bf16.msra.mxu0 %v833_v12 }
  0x5f   :  { %403 = vmatpush2.bf16.msra.mxu1 %v802_v29 }
  0x60   :  { %404 = vmatprep.subr.bf16.mxu1 %v803_v30 }
  0x63   :  { %405 = vmatpush2.bf16.msra.mxu1 %v805_v31  ;;  %v607_v31 = vld [vmem:[%s1045_s7] sm:$0x3] }
  0x64   :  { %406 = vmatprep.subr.bf16.mxu1 %v806_v32  ;;  %v706_v32 = vld [vmem:[%s1044_s6] ss:$0 sm:$0xff]  ;;  %s959_s6 = smov [#allocation10]  }
  0x65   :  { %s655_s7 = sshll.u32 %s959_s6, 4  ;;  %s656_s7 = int_to_ptr.vmem [resolvable:$true] %s655_s7 }
  0x66   :  { %s922_s9 = scalar_lea.vmem %s656_s7, 128  ;;  %p927_p7 = scmp.lt.s32.totalorder %s656_s7, %s656_s7 }
  0x67   :  { %407 = vmatpush2.bf16.msra.mxu1 %v808_v33  ;;  %p923_p6 = scmp.ne.s32.totalorder %s656_s7, %s922_s9  ;;  %p928_p8 = scmp.lt.s32.totalorder %s922_s9, %s922_s9 }
  0x68   :  { %408 = vmatprep.subr.bf16.mxu1 %v809_v34 }
  0x69   :  { %p929_p9 = por %p928_p8, %p927_p7 }
  0x6b   :  { %409 = vmatpush2.bf16.msra.mxu1 %v811_v35  ;;  %v635_v35 = vrot.slane %v607_v31, %v101_v52  ;;  %p930_p10 = pnand %p929_p9, %p923_p6 }
  0x6c   :  { %410 = vmatprep.subr.bf16.mxu1 %v812_v36  ;;  %v611_v36 = vrot.slane %v607_v31, %v97_v53 }
  0x6f   :  { %411 = vmatpush2.bf16.msra.mxu1 %v814_v37 }
  0x70   :  { %412 = vmatprep.subr.bf16.mxu1 %v815_v38 }
  0x73   :  { %413 = vmatpush2.bf16.msra.mxu1 %v817_v39 }
  0xfb   :  { %v163_v55 = vpop.f32.mrf.mxu0 }
  0xfc   :  { %v164_v62 = vadd.f32 %v163_v55, %v98_v57 }
  0xfd   :  { %v165_v58 = vpop.f32.mrf.mxu0 }
  0xfe   :  { %v166_v60 = vadd.f32 %v165_v58, %v102_v56  ;;  %v172_v4 = vmax.f32 %v164_v62, 0.0 }
  0xff   :  { %v167_v59 = vpop.f32.mrf.mxu0 }
 0x100   :  { %v168_v61 = vadd.f32 %v167_v59, %v98_v57  ;;  %v173_v2 = vmax.f32 %v166_v60, 0.0 }
 0x101   :  { %v169_v63 = vpop.f32.mrf.mxu0 }
 0x102   :  { %v170_v0 = vadd.f32 %v169_v63, %v102_v56  ;;  %v174_v1 = vmax.f32 %v168_v61, 0.0 }
 0x104   :  { %v175_v3 = vmax.f32 %v170_v0, 0.0  ;;  %v176_v6 = vpack.c.bf16 %v174_v1, %v172_v4 }
 0x106   :  { %v177_v5 = vpack.c.bf16 %v175_v3, %v173_v2 }
 0x108   :  { %414 = vmatprep.mubr.bf16.mxu1 %v177_v5 }
 0x109   :  { %415 = vmatmul.mubr.bf16.vlgmr.msra.gmra.mxu1 %v176_v6 }
 0x1c9   :  { %v416_v14 = vpop.f32.mrf.mxu1 }
 0x1ca   :  { %v417_v21 = vadd.f32 %v416_v14, %v215_v16 }
 0x1cb   :  { %v418_v17 = vpop.f32.mrf.mxu1 }
 0x1cc   :  { %v419_v19 = vadd.f32 %v418_v17, %v219_v15  ;;  %v425_v27 = vmax.f32 %v417_v21, 0.0 }
 0x1cd   :  { %v420_v18 = vpop.f32.mrf.mxu1 }
 0x1ce   :  { %v421_v20 = vadd.f32 %v420_v18, %v215_v16  ;;  %v426_v25 = vmax.f32 %v419_v19, 0.0 }
 0x1cf   :  { %v422_v22 = vpop.f32.mrf.mxu1 }
 0x1d0   :  { %v423_v23 = vadd.f32 %v422_v22, %v219_v15  ;;  %v427_v24 = vmax.f32 %v421_v20, 0.0 }
 0x1d2   :  { %v428_v26 = vmax.f32 %v423_v23, 0.0  ;;  %v429_v29 = vpack.c.bf16 %v427_v24, %v425_v27 }
 0x1d4   :  { %v430_v28 = vpack.c.bf16 %v428_v26, %v426_v25 }
 0x1d6   :  { %598 = vmatprep.mubr.bf16.mxu0 %v430_v28 }
 0x1d7   :  { %599 = vmatmul.mubr.bf16.vlgmr.msra.gmra.mxu0 %v429_v29 }
 0x297   :  { %v748_v30 = vpop.f32.mrf.mxu0 }
 0x299   :  { %v749_v33 = vpop.f32.mrf.mxu0 }
 0x29a   :  { %v750_v34 = vadd.f32 %v749_v33, %v748_v30 }
 0x29b   :  { %v751_v37 = vpop.f32.mrf.mxu0 }
 0x29c   :  { %v601_v38 = vadd.f32 %v750_v34, %v706_v32 }
 0x29d   :  { %v752_v39 = vpop.f32.mrf.mxu0 }
 0x29e   :  { %v636_v40 = vmul.f32 %v635_v35, %v601_v38  ;;  %v753_v41 = vadd.f32 %v752_v39, %v751_v37  ;;  %v612_v42 = vadd.f32 %v611_v36, %v601_v38 }
 0x2a0   :  { %v604_v43 = vadd.f32 %v753_v41, %v706_v32  ;;  %614 = vmax.xlane.f32.xlu0 %v612_v42 }
 0x2a2   :  { %v637_v44 = vmul.f32 %v635_v35, %v604_v43  ;;  %v613_v45 = vadd.f32 %v611_v36, %v604_v43 }
 0x2a4   :  { %616 = vmax.xlane.f32.xlu0 %v613_v45 }
 0x329   :  { %v615_v46 = vpop.xlane.xlu0 %614 }
 0x32a   :  { %v618_v47 = vsub.f32 %v612_v42, %v615_v46 }
 0x32c   :  { %v620_v48 = vmul.f32 1.442695, %v618_v47 }
 0x32d   :  { %v617_v49 = vpop.xlane.xlu0 %616 }
 0x32e   :  { %834 = vpow2.f32 %v620_v48  ;;  %v619_v50 = vsub.f32 %v613_v45, %v617_v49 }
 0x330   :  { %v622_v51 = vmul.f32 1.442695, %v619_v50 }
 0x332   :  { %836 = vpow2.f32 %v622_v51 }
 0x33b   :  { %v835_v52 = vpop.eup %834 }
 0x33c   :  { %624 = vadd.xlane.f32.xlu1 %v835_v52 }
 0x33f   :  { %v837_v53 = vpop.eup %836 }
 0x340   :  { %626 = vadd.xlane.f32.xlu1 %v837_v53 }
 0x3c5   :  { %v625_v54 = vpop.xlane.xlu1 %624 }
 0x3c6   :  { %838 = vrcp.f32 %v625_v54 }
 0x3c9   :  { %v627_v55 = vpop.xlane.xlu1 %626 }
 0x3ca   :  { %840 = vrcp.f32 %v627_v55 }
 0x3d3   :  { %v839_v56 = vpop.eup %838 }
 0x3d4   :  { %v630_v57 = vmul.f32 %v839_v56, %v835_v52 }
 0x3d6   :  { %v638_v60 = vadd.f32 %v636_v40, %v630_v57 }
 0x3d7   :  { %v841_v58 = vpop.eup %840 }
 0x3d8   :  { %v631_v59 = vmul.f32 %v841_v58, %v837_v53 }
 0x3da   :  { %v639_v61 = vadd.f32 %v637_v44, %v631_v59 }
 0x3dc   :  { %v730_v62 = vpack.c.bf16 %v639_v61, %v638_v60 }
 0x3de   :  { %731 = vst [vmem:[#allocation10] sm:$0xff] %v730_v62  }
 0x3df   :  { %933 = shalt.err (!%p930_p10)
}
 0x3e0   :  { %661 = dma.vmem_to_hbm [thread:$0]  %s656_s7, 128, %s1046_s8, [#allocation4], %s956_s0, %s956_s0, %s957_s24  }
 0x3e1   :  { %948 = dma.done.wait [#allocation4], 128  }
 0x3e2   :  { %949 = vsyncadd [#allocation4], 4294967168 }
 0x3e3   :  { %665 = vsyncpa [#allocation3], 1 }
 0x3e4   :  { %666 = vsyncpa [#allocation6], 1 }
 0x3e5   :  { %667 = vsyncpa [#allocation9], 1 }
 0x3e6   :  { %668 = vsyncpa [#allocation4], 1 }

</bundles_post_ra>
